<compile_context>
chip_gen: v5e
topology: v5e:2x2
jax: 0.10.0
libtpu: 0.0.40
codegen_flags: <defaults>
</compile_context>

<pallas_src>
import jax
import jax.numpy as jnp
from jax.experimental import pallas as pl
from jax.experimental.pallas import tpu as pltpu

H = 0.5            # kernel bandwidth (hard-coded in the PyTorch forward)
SENTINEL = 1.0e4   # scaled coordinate for absent points: d2 ~ 1e8 -> exp -> 0


def _round_up(x, m):
    return ((x + m - 1) // m) * m


def _vmem_limit_bytes(tb, tp, M):
    lane = lambda n: _round_up(n, 128)
    sub = lambda n: _round_up(n, 8)
    # one buffer set: px + py blocks, theta, resident output block (f32)
    per_set = 4 * (2 * tb * lane(tp) + sub(M) * lane(2) + tb * lane(M))
    est = 2 * per_set                      # double-buffered pipeline
    # generous headroom for compiler scratch; clamp to a cross-generation-safe
    # range (>= v5e's 16 MiB scoped default, < v7x's 64 MiB physical VMEM).
    return int(min(max(3 * est, 16 * 1024 * 1024), 48 * 1024 * 1024))


def perslay_kernel(theta_ref, px_ref, py_ref, out_ref):
    # theta_ref : (M, 2)   -- pre-scaled theta (x in col 0, y in col 1)
    # px_ref    : (TB, TP) -- pre-scaled x coords, sentinel in padded slots
    # py_ref    : (TB, TP) -- pre-scaled y coords
    # out_ref   : (TB, M)  -- per-diagram observer sums, resident accumulator
    @pl.when(pl.program_id(1) == 0)
    def _init():
        out_ref[...] = jnp.zeros_like(out_ref)

    tx = theta_ref[:, 0:1][None, :, :]        # (1, M, 1)  ref-sliced load
    ty = theta_ref[:, 1:2][None, :, :]        # (1, M, 1)

    px = px_ref[...][:, None, :]              # (TB, 1, TP) lane-dense
    py = py_ref[...][:, None, :]              # (TB, 1, TP)

    dx = px - tx                              # (TB, M, TP)
    dy = py - ty                              # (TB, M, TP)
    e = jnp.exp(-(dx * dx + dy * dy))         # EUP; sentinel slots underflow to 0

    out_ref[...] += jnp.sum(e, axis=-1)       # lane reduction on XLU


def perslay_forward(theta, points, mask, fc_weight, fc_bias, *,
                    tb=256, tp_max=512):
    """theta: (M, 2), points: (B, P, 2), mask: (B, P),
    fc_weight: (L, M), fc_bias: (L,)  ->  (B, L)"""
    B, P, _ = points.shape
    M = theta.shape[0]

    # Fold 1/(2*h^2) into the coordinates:  ||s*(t - p)||^2 = ||t - p||^2/(2h^2)
    scale = jnp.float32(1.0) / (jnp.sqrt(jnp.float32(2.0)) * H)
    theta_s = theta.astype(jnp.float32) * scale                      # (M, 2)

    # Single fused pass: scale + sentinel-select + x/y split (no maskb array).
    coords = points.astype(jnp.float32) * scale                      # (B, P, 2)
    keep = mask.astype(jnp.float32) > 0.5
    px = jnp.where(keep, coords[..., 0], SENTINEL)                   # (B, P)
    py = jnp.where(keep, coords[..., 1], SENTINEL)                   # (B, P)

    # Tile sizes: batch tile is a multiple of 8 (sublane), clamped for small B;
    # P is the lane axis, tiled only when it exceeds tp_max.
    tb = _round_up(max(8, min(tb, _round_up(B, 8))), 8)
    B_pad = pl.cdiv(B, tb) * tb
    if P <= tp_max:
        tp, P_pad = P, P
    else:
        tp = tp_max
        P_pad = pl.cdiv(P, tp) * tp

    pad_b, pad_p = B_pad - B, P_pad - P
    if pad_b or pad_p:
        px = jnp.pad(px, ((0, pad_b), (0, pad_p)), constant_values=SENTINEL)
        py = jnp.pad(py, ((0, pad_b), (0, pad_p)), constant_values=SENTINEL)

    grid = (B_pad // tb, P_pad // tp)

    s = pl.pallas_call(
        perslay_kernel,
        out_shape=jax.ShapeDtypeStruct((B_pad, M), jnp.float32),
        grid=grid,
        in_specs=[
            pl.BlockSpec((M, 2), lambda i, j: (0, 0)),      # theta (shared)
            pl.BlockSpec((tb, tp), lambda i, j: (i, j)),    # x coords
            pl.BlockSpec((tb, tp), lambda i, j: (i, j)),    # y coords
        ],
        # Output block index is independent of j -> resident f32 accumulator.
        # TODO(synk): for large B, emit S transposed (M, B_pad) with tb >= 128
        #   lanes for unmasked stores; output bytes are tiny so low priority.
        out_specs=pl.BlockSpec((tb, M), lambda i, j: (i, 0)),
        compiler_params=pltpu.CompilerParams(
            dimension_semantics=("parallel", "arbitrary"),
            vmem_limit_bytes=_vmem_limit_bytes(tb, tp, M)),
    )(theta_s, px, py)

    # Final Linear hoisted out of the kernel: one batched (B, M) @ (M, L).
    s = s[:B]
    return s @ fc_weight.T.astype(jnp.float32) + fc_bias.astype(jnp.float32)


def perslay_ref(theta, points, mask, fc_weight, fc_bias):
    """Pure-JAX reference with identical semantics to the PyTorch module."""
    diff = theta[None, :, None, :] - points[:, None, :, :]   # (B, M, P, 2)
    d2 = jnp.sum(diff * diff, axis=-1)                        # (B, M, P)
    e = jnp.exp(-d2 / (2.0 * H * H)) * mask[:, None, :]
    s = jnp.sum(e, axis=-1)                                   # (B, M)
    return s @ fc_weight.T + fc_bias


if __name__ == "__main__":
    num_obsrv = 10     # M
    num_labels = 3     # L
    B, P = 3, 8        # batch of diagrams, max points per diagram

    key = jax.random.PRNGKey(0)
    k_theta, k_w, k_b, k_pts = jax.random.split(key, 4)

    # Parameters (matching the PyTorch shapes / init ranges):
    #   theta ~ U[0, 4) of shape (num_obsrv, 2)
    #   fc    = Linear(num_obsrv, num_labels), U(-1/sqrt(M), 1/sqrt(M))
    theta = jax.random.uniform(k_theta, (num_obsrv, 2), jnp.float32) * 4.0
    bound = 1.0 / jnp.sqrt(jnp.float32(num_obsrv))
    fc_weight = jax.random.uniform(
        k_w, (num_labels, num_obsrv), jnp.float32, -bound, bound)
    fc_bias = jax.random.uniform(
        k_b, (num_labels,), jnp.float32, -bound, bound)

    # Input diagrams: dense (B, P, 2) + mask.
    #   diagram 0: P points, diagram 1: 5 points, diagram 2: empty list
    points = jax.random.uniform(k_pts, (B, P, 2), jnp.float32) * 4.0
    mask = jnp.array(
        [[1.0] * P,
         [1.0] * 5 + [0.0] * (P - 5),
         [0.0] * P], dtype=jnp.float32)
    points = points * mask[:, :, None]   # zero padded slots (sentinel overrides)

    out = perslay_forward(theta, points, mask, fc_weight, fc_bias)
    out = jax.block_until_ready(out)

    ref = perslay_ref(theta, points, mask, fc_weight, fc_bias)
    assert out.shape == (B, num_labels)
    assert jnp.allclose(out, ref, atol=1e-5, rtol=1e-4), (out, ref)

    print("KERNEL_OK")
</pallas_src>

<mosaic_0001>
module attributes {stable_mosaic.version = 11 : i64} {
  func.func @perslay_kernel(%arg0: i32, %arg1: i32, %arg2: memref<10x2xf32, #tpu.memory_space<vmem>>, %arg3: memref<8x8xf32, #tpu.memory_space<vmem>>, %arg4: memref<8x8xf32, #tpu.memory_space<vmem>>, %arg5: memref<8x10xf32, #tpu.memory_space<vmem>>) attributes {dimension_semantics = [#tpu.dimension_semantics<parallel>, #tpu.dimension_semantics<arbitrary>], iteration_bounds = array<i64: 1, 1>, scalar_prefetch = 0 : i64, scratch_operands = 0 : i64, tpu.core_type = #tpu.core_type<tc>, window_params = [{pipeline_mode = #tpu.pipeline_mode<synchronous>, transform_indices = @transform_0, window_bounds = array<i64: 10, 2>}, {transform_indices = @transform_1, window_bounds = array<i64: 8, 8>}, {transform_indices = @transform_2, window_bounds = array<i64: 8, 8>}, {transform_indices = @transform_3, window_bounds = array<i64: 8, 10>}]} {
    %c0_i32 = arith.constant 0 : i32
    %0 = arith.cmpi eq, %arg1, %c0_i32 : i32
    %1 = arith.extui %0 : i1 to i32
    %c0_i32_0 = arith.constant 0 : i32
    %2 = arith.cmpi ne, %1, %c0_i32_0 : i32
    scf.if %2 {
      %cst_12 = arith.constant 0.000000e+00 : f32
      %27 = vector.broadcast %cst_12 : f32 to vector<8x10xf32>
      %c0_13 = arith.constant 0 : index
      %c0_14 = arith.constant 0 : index
      %28 = vector.load %arg5[%c0_13, %c0_14] : memref<8x10xf32, #tpu.memory_space<vmem>>, vector<8x10xf32>
      tpu.vector_store %arg5[%c0_13, %c0_14], %27 {strides = array<i32>} : memref<8x10xf32, #tpu.memory_space<vmem>>, vector<8x10xf32>,
    } else {
    }
    %c0 = arith.constant 0 : index
    %c0_1 = arith.constant 0 : index
    %3 = vector.load %arg2[%c0, %c0_1] : memref<10x2xf32, #tpu.memory_space<vmem>>, vector<10x1xf32>
    %4 = vector.shape_cast %3 : vector<10x1xf32> to vector<1x10x1xf32>
    %c0_2 = arith.constant 0 : index
    %c1 = arith.constant 1 : index
    %5 = vector.load %arg2[%c0_2, %c1] : memref<10x2xf32, #tpu.memory_space<vmem>>, vector<10x1xf32>
    %6 = vector.shape_cast %5 : vector<10x1xf32> to vector<1x10x1xf32>
    %c0_3 = arith.constant 0 : index
    %c0_4 = arith.constant 0 : index
    %7 = vector.load %arg3[%c0_3, %c0_4] : memref<8x8xf32, #tpu.memory_space<vmem>>, vector<8x8xf32>
    %8 = vector.shape_cast %7 : vector<8x8xf32> to vector<8x1x8xf32>
    %c0_5 = arith.constant 0 : index
    %c0_6 = arith.constant 0 : index
    %9 = vector.load %arg4[%c0_5, %c0_6] : memref<8x8xf32, #tpu.memory_space<vmem>>, vector<8x8xf32>
    %10 = vector.shape_cast %9 : vector<8x8xf32> to vector<8x1x8xf32>
    %11 = vector.broadcast %8 : vector<8x1x8xf32> to vector<8x10x8xf32>
    %12 = vector.broadcast %4 : vector<1x10x1xf32> to vector<8x10x8xf32>
    %13 = arith.subf %11, %12 : vector<8x10x8xf32>
    %14 = vector.broadcast %10 : vector<8x1x8xf32> to vector<8x10x8xf32>
    %15 = vector.broadcast %6 : vector<1x10x1xf32> to vector<8x10x8xf32>
    %16 = arith.subf %14, %15 : vector<8x10x8xf32>
    %17 = arith.mulf %13, %13 : vector<8x10x8xf32>
    %18 = arith.mulf %16, %16 : vector<8x10x8xf32>
    %19 = arith.addf %17, %18 : vector<8x10x8xf32>
    %cst = arith.constant 0.000000e+00 : f32
    %20 = vector.broadcast %cst : f32 to vector<8x10x8xf32>
    %21 = arith.subf %20, %19 : vector<8x10x8xf32>
    %22 = math.exp %21 : vector<8x10x8xf32>
    %c0_7 = arith.constant 0 : index
    %c0_8 = arith.constant 0 : index
    %23 = vector.load %arg5[%c0_7, %c0_8] : memref<8x10xf32, #tpu.memory_space<vmem>>, vector<8x10xf32>
    %cst_9 = arith.constant dense<0.000000e+00> : vector<8x10xf32>
    %24 = vector.multi_reduction <add>, %22, %cst_9 [2] : vector<8x10x8xf32> to vector<8x10xf32>
    %25 = arith.addf %23, %24 : vector<8x10xf32>
    %c0_10 = arith.constant 0 : index
    %c0_11 = arith.constant 0 : index
    %26 = vector.load %arg5[%c0_10, %c0_11] : memref<8x10xf32, #tpu.memory_space<vmem>>, vector<8x10xf32>
    tpu.vector_store %arg5[%c0_10, %c0_11], %25 {strides = array<i32>} : memref<8x10xf32, #tpu.memory_space<vmem>>, vector<8x10xf32>,
    return
  }
  func.func @transform_0(%arg0: i32, %arg1: i32) -> (i32, i32) {
    %c0_i32 = arith.constant 0 : i32
    %c0_i32_0 = arith.constant 0 : i32
    %c0_i32_1 = arith.constant 0 : i32
    return %c0_i32, %c0_i32_0 : i32, i32
  }
  func.func @transform_1(%arg0: i32, %arg1: i32) -> (i32, i32) {
    %c0_i32 = arith.constant 0 : i32
    return %arg0, %arg1 : i32, i32
  }
  func.func @transform_2(%arg0: i32, %arg1: i32) -> (i32, i32) {
    %c0_i32 = arith.constant 0 : i32
    return %arg0, %arg1 : i32, i32
  }
  func.func @transform_3(%arg0: i32, %arg1: i32) -> (i32, i32) {
    %c0_i32 = arith.constant 0 : i32
    %c0_i32_0 = arith.constant 0 : i32
    return %arg0, %c0_i32 : i32, i32
  }
}

</mosaic_0001>

<bundles_post_ra>
// kernel: tpu_custom_call.1
= control target key start
LH: loop header
LB: loop body
LE: loop exit
PB: predicated region body
PF: predicated region fallthrough
CT: control target
= control target key end

     0   :  { %v413_v1 = vmov 1   ;;  %v414_v2 = vmov 0   ;;  %s574_s0 = inlined_call_operand.vmem [shape: f32[10,2], index: 0, kind: input, shape index: {}]   ;;  %s575_s1 = inlined_call_operand.vmem [shape: f32[8,8], index: 1, kind: input, shape index: {}]   ;;  %s576_s2 = inlined_call_operand.vmem [shape: f32[8,8], index: 2, kind: input, shape index: {}]   ;;  %s577_s3 = inlined_call_operand.hbm [shape: f32[8,10], index: 3, kind: output, shape index: {}]  }
   0x1   :  { %v21_v0 = vld [vmem:[%s574_s0] sm:$0xff]  ;;  %353 = vset.pattern.permute.xlu1 %v413_v1  ;;  %352 = vset.pattern.permute.xlu0 %v414_v2 }
   0x2   :  { %8 = vsyncpa [#allocation3], 0  ;;  %100 = vperm.xlu1 %353, %v21_v0   ;;  %59 = vperm.xlu0 %352, %v21_v0   ;;  %v22_v3 = vld [vmem:[%s574_s0 + $0x8] sm:$0x3]  ;;  %v446_v4 = vld [vmem:[%s575_s1] sm:$0xff]  ;;  %vm220_vm0 = vcmask 64512  }
   0x3   :  { %v451_v5 = vld [vmem:[%s576_s2] sm:$0xff]  ;;  %v25_v6 = vrot.slane %v446_v4, 1  ;;  %v29_v8 = vrot.slane %v446_v4, 5  ;;  %v26_v10 = vrot.slane %v446_v4, 2  ;;  %v31_v12 = vrot.slane %v446_v4, 7  ;;  %s416_s0 = smov [#allocation2]  }
   0x4   :  { %v34_v7 = vrot.slane %v451_v5, 1  ;;  %v38_v9 = vrot.slane %v451_v5, 5  ;;  %v35_v11 = vrot.slane %v451_v5, 2  ;;  %v41_v15 = vperm.slane %v446_v4, 0  ;;  %s337_s1 = sshll.u32 %s416_s0, 4  ;;  %s339_s21 = sshll.u32 %s577_s3, 4  ;;  %s338_s1 = int_to_ptr.vmem [resolvable:$true] %s337_s1  ;;  %s340_s21 = int_to_ptr.hbm [resolvable:$true] %s339_s21 }
   0x5   :  { %v42_v13 = vperm.slane %v25_v6, 0  ;;  %v83_v16 = vperm.slane %v451_v5, 0  ;;  %v46_v17 = vperm.slane %v29_v8, 0  ;;  %v464_v19 = vperm.slane %v26_v10, 0 }
   0x6   :  { %v84_v14 = vperm.slane %v34_v7, 0  ;;  %v462_v18 = vperm.slane %v38_v9, 0  ;;  %v466_v20 = vperm.slane %v35_v11, 0  ;;  %v30_v21 = vrot.slane %v446_v4, 6 }
   0x7   :  { %v39_v24 = vrot.slane %v451_v5, 6  ;;  %v40_v25 = vrot.slane %v451_v5, 7  ;;  %v475_v26 = vperm.slane %v31_v12, 0  ;;  %v27_v27 = vrot.slane %v446_v4, 3 }
   0x8   :  { %v36_v43 = vrot.slane %v451_v5, 3  ;;  %v492_v47 = vperm.slane %v30_v21, 0  ;;  %vm224_vm1 = vcmask 58368   ;;  %vm19_vm2 = vcmask 80896  }
   0x9   :  { %v489_v42 = vperm.slane %v40_v25, 0  ;;  %v494_v52 = vperm.slane %v39_v24, 0  ;;  %v496_v53 = vperm.slane %v27_v27, 0  ;;  %vm291_vm3 = vcmask 130112  }
   0xa   :  { %104 = vperm.xlu1 %353, %v22_v3   ;;  %64 = vperm.xlu0 %352, %v22_v3   ;;  %v506_v59 = vperm.slane %v36_v43, 0  ;;  %vm314_vm4 = vcmask 1041409   ;;  %vm316_vm5 = vcmask 1042434   ;;  %vm318_vm6 = vcmask 1043459  }
   0xb   :  { %vm320_vm7 = vcmask 1044484   ;;  %vm322_vm8 = vcmask 1045509   ;;  %vm324_vm9 = vcmask 1046534   ;;  %vm326_vm10 = vcmask 1047559  }
  0x12   :  { %354 = vset.pattern.permute.xlu0 %v413_v1 }
  0x74   :  { %v469_v22 = vpop.permute.xlu1 %100  ;;  %v471_v23 = vpop.permute.xlu0 %59 }
  0x75   :  { %v69_v28 = vsub.f32 %v42_v13, %v471_v23  ;;  %v109_v29 = vsub.f32 %v84_v14, %v469_v22  ;;  %v67_v30 = vsub.f32 %v41_v15, %v471_v23  ;;  %v107_v31 = vsub.f32 %v83_v16, %v469_v22 }
  0x76   :  { %v77_v32 = vsub.f32 %v46_v17, %v471_v23  ;;  %v117_v33 = vsub.f32 %v462_v18, %v469_v22  ;;  %v71_v34 = vsub.f32 %v464_v19, %v471_v23  ;;  %v111_v35 = vsub.f32 %v466_v20, %v469_v22 }
  0x77   :  { %v125_v36 = vmul.f32 %v69_v28, %v69_v28  ;;  %v141_v37 = vmul.f32 %v109_v29, %v109_v29  ;;  %v123_v38 = vmul.f32 %v67_v30, %v67_v30  ;;  %v139_v39 = vmul.f32 %v107_v31, %v107_v31 }
  0x78   :  { %v133_v40 = vmul.f32 %v77_v32, %v77_v32  ;;  %v149_v41 = vmul.f32 %v117_v33, %v117_v33  ;;  %v127_v48 = vmul.f32 %v71_v34, %v71_v34  ;;  %v143_v49 = vmul.f32 %v111_v35, %v111_v35 }
  0x79   :  { %v157_v44 = vadd.f32 %v141_v37, %v125_v36  ;;  %v155_v45 = vadd.f32 %v139_v39, %v123_v38  ;;  %v81_v57 = vsub.f32 %v475_v26, %v471_v23  ;;  %v121_v58 = vsub.f32 %v489_v42, %v469_v22 }
  0x7a   :  { %v165_v46 = vadd.f32 %v149_v41, %v133_v40  ;;  %v159_v3 = vadd.f32 %v143_v49, %v127_v48  ;;  %v113_v48 = vsub.f32 %v506_v59, %v469_v22 }
  0x7b   :  { %v173_v50 = vsub.f32 0.0, %v157_v44  ;;  %v171_v51 = vsub.f32 0.0, %v155_v45  ;;  %v137_v32 = vmul.f32 %v81_v57, %v81_v57  ;;  %v153_v33 = vmul.f32 %v121_v58, %v121_v58 }
  0x7c   :  { %v498_v54 = vpop.permute.xlu1 %104  ;;  %v500_v55 = vpop.permute.xlu0 %64  ;;  %v181_v56 = vsub.f32 0.0, %v165_v46  ;;  %v175_v24 = vsub.f32 0.0, %v159_v3 }
  0x7d   :  { %v191_v60 = vmul.f32 1.442695, %v173_v50  ;;  %v187_v61 = vmul.f32 1.442695, %v171_v51  ;;  %v70_v62 = vsub.f32 %v42_v13, %v500_v55  ;;  %v110_v63 = vsub.f32 %v84_v14, %v498_v54 }
  0x7e   :  { %v68_v0 = vsub.f32 %v41_v15, %v500_v55  ;;  %v108_v1 = vsub.f32 %v83_v16, %v498_v54  ;;  %v80_v2 = vsub.f32 %v492_v47, %v500_v55  ;;  %v120_v8 = vsub.f32 %v494_v52, %v498_v54 }
  0x7f   :  { %355 = vpow2.f32 %v191_v60  ;;  %v126_v6 = vmul.f32 %v70_v62, %v70_v62  ;;  %v142_v7 = vmul.f32 %v110_v63, %v110_v63  ;;  %v207_v12 = vmul.f32 1.442695, %v181_v56 }
  0x80   :  { %357 = vpow2.f32 %v187_v61  ;;  %v124_v9 = vmul.f32 %v68_v0, %v68_v0  ;;  %v140_v10 = vmul.f32 %v108_v1, %v108_v1  ;;  %v136_v11 = vmul.f32 %v80_v2, %v80_v2 }
  0x81   :  { %v158_v13 = vadd.f32 %v142_v7, %v126_v6  ;;  %v152_v14 = vmul.f32 %v120_v8, %v120_v8  ;;  %v78_v15 = vsub.f32 %v46_v17, %v500_v55  ;;  %v118_v21 = vsub.f32 %v462_v18, %v498_v54 }
  0x82   :  { %v156_v16 = vadd.f32 %v140_v10, %v124_v9  ;;  %v72_v29 = vsub.f32 %v464_v19, %v500_v55  ;;  %359 = vpow2.f32 %v207_v12  ;;  %v112_v36 = vsub.f32 %v466_v20, %v498_v54 }
  0x83   :  { %v174_v25 = vsub.f32 0.0, %v158_v13  ;;  %v168_v27 = vadd.f32 %v152_v14, %v136_v11  ;;  %v134_v28 = vmul.f32 %v78_v15, %v78_v15  ;;  %v150_v31 = vmul.f32 %v118_v21, %v118_v21 }
  0x84   :  { %v172_v30 = vsub.f32 0.0, %v156_v16  ;;  %v128_v40 = vmul.f32 %v72_v29, %v72_v29  ;;  %v195_v41 = vmul.f32 1.442695, %v175_v24  ;;  %v144_v43 = vmul.f32 %v112_v36, %v112_v36 }
  0x85   :  { %v356_v34 = vpop.eup %355  ;;  %v193_v35 = vmul.f32 1.442695, %v174_v25  ;;  %v184_v17 = vsub.f32 0.0, %v168_v27  ;;  %v166_v39 = vadd.f32 %v150_v31, %v134_v28  ;;  %v169_v46 = vadd.f32 %v153_v33, %v137_v32 }
  0x86   :  { %v358_v37 = vpop.eup %357  ;;  %v228_v18 = vsel %vm220_vm0, %v356_v34, 0.0  ;;  %v189_v38 = vmul.f32 1.442695, %v172_v30  ;;  %v73_v20 = vsub.f32 %v496_v53, %v471_v23  ;;  %v160_v50 = vadd.f32 %v144_v43, %v128_v40 }
  0x87   :  { %229 = vadd.xlane.f32.xlu0 %v228_v18  ;;  %v221_v19 = vsel %vm220_vm0, %v358_v37, 0.0  ;;  %361 = vpow2.f32 %v193_v35  ;;  %v213_v44 = vmul.f32 1.442695, %v184_v17  ;;  %v182_v45 = vsub.f32 0.0, %v166_v39 }
  0x88   :  { %222 = vadd.xlane.f32.xlu2 %v221_v19  ;;  %363 = vpow2.f32 %v189_v38  ;;  %v360_v51 = vpop.eup %359  ;;  %v185_v56 = vsub.f32 0.0, %v169_v46  ;;  %v129_v58 = vmul.f32 %v73_v20, %v73_v20  ;;  %v145_v60 = vmul.f32 %v113_v48, %v113_v48 }
  0x89   :  { %v209_v49 = vmul.f32 1.442695, %v182_v45  ;;  %365 = vpow2.f32 %v195_v41  ;;  %v252_v62 = vsel %vm220_vm0, %v360_v51, 0.0  ;;  %v176_v0 = vsub.f32 0.0, %v160_v50 }
  0x8a   :  { %367 = vpow2.f32 %v213_v44  ;;  %v79_v1 = vsub.f32 %v492_v47, %v471_v23  ;;  %v215_v3 = vmul.f32 1.442695, %v185_v56  ;;  %v28_v6 = vrot.slane %v446_v4, 4 }
  0x8b   :  { %369 = vpow2.f32 %v209_v49  ;;  %v37_v7 = vrot.slane %v451_v5, 4  ;;  %v119_v8 = vsub.f32 %v494_v52, %v469_v22  ;;  %v161_v10 = vadd.f32 %v145_v60, %v129_v58 }
  0x8c   :  { %v74_v11 = vsub.f32 %v496_v53, %v500_v55  ;;  %v114_v47 = vsub.f32 %v506_v59, %v498_v54  ;;  %v135_v12 = vmul.f32 %v79_v1, %v79_v1  ;;  %v197_v14 = vmul.f32 1.442695, %v176_v0 }
  0x8d   :  { %v362_v57 = vpop.eup %361  ;;  %v151_v15 = vmul.f32 %v119_v8, %v119_v8  ;;  %v45_v21 = vperm.slane %v28_v6, 0  ;;  %v87_v4 = vperm.slane %v37_v7, 0  ;;  %371 = vpow2.f32 %v215_v3 }
  0x8e   :  { %v364_v61 = vpop.eup %363  ;;  %v231_v63 = vsel %vm224_vm1, %v362_v57, 0.0  ;;  %v177_v5 = vsub.f32 0.0, %v161_v10  ;;  %v130_v25 = vmul.f32 %v74_v11, %v74_v11  ;;  %v146_v52 = vmul.f32 %v114_v47, %v114_v47 }
  0x8f   :  { %253 = vadd.xlane.f32.xlu0 %v252_v62  ;;  %232 = vadd.xlane.f32.xlu1 %v231_v63  ;;  %v225_v2 = vsel %vm224_vm1, %v364_v61, 0.0  ;;  %v366_v9 = vpop.eup %365  ;;  %v167_v24 = vadd.f32 %v151_v15, %v135_v12  ;;  %373 = vpow2.f32 %v197_v14  ;;  %v75_v30 = vsub.f32 %v45_v21, %v471_v23 }
  0x90   :  { %226 = vadd.xlane.f32.xlu2 %v225_v2  ;;  %v368_v13 = vpop.eup %367  ;;  %v234_v59 = vsel %vm220_vm0, %v366_v9, 0.0  ;;  %v199_v31 = vmul.f32 1.442695, %v177_v5  ;;  %v162_v32 = vadd.f32 %v146_v52, %v130_v25  ;;  %v115_v33 = vsub.f32 %v87_v4, %v469_v22 }
  0x91   :  { %v370_v16 = vpop.eup %369  ;;  %v261_v27 = vsel %vm224_vm1, %v368_v13, 0.0  ;;  %v183_v53 = vsub.f32 0.0, %v167_v24  ;;  %v131_v17 = vmul.f32 %v75_v30, %v75_v30  ;;  %v76_v22 = vsub.f32 %v45_v21, %v500_v55 }
  0x92   :  { %v255_v28 = vsel %vm224_vm1, %v370_v16, 0.0  ;;  %v178_v37 = vsub.f32 0.0, %v162_v32  ;;  %v147_v18 = vmul.f32 %v115_v33, %v115_v33  ;;  %v116_v41 = vsub.f32 %v87_v4, %v498_v54 }
  0x93   :  { %v211_v29 = vmul.f32 1.442695, %v183_v53  ;;  %v372_v34 = vpop.eup %371  ;;  %v132_v45 = vmul.f32 %v76_v22, %v76_v22  ;;  %v82_v58 = vsub.f32 %v475_v26, %v500_v55  ;;  %v122_v60 = vsub.f32 %v489_v42, %v498_v54 }
  0x94   :  { %v264_v36 = vsel %vm220_vm0, %v372_v34, 0.0  ;;  %v201_v40 = vmul.f32 1.442695, %v178_v37  ;;  %v163_v19 = vadd.f32 %v147_v18, %v131_v17  ;;  %v148_v46 = vmul.f32 %v116_v41, %v116_v41 }
  0x95   :  { %375 = vpow2.f32 %v211_v29  ;;  %v374_v35 = vpop.eup %373  ;;  %v138_v62 = vmul.f32 %v82_v58, %v82_v58  ;;  %v154_v63 = vmul.f32 %v122_v60, %v122_v60  ;;  %v415_v47 = vmov 0.0  }
  0x96   :  { %377 = vpow2.f32 %v199_v31  ;;  %v237_v38 = vsel %vm224_vm1, %v374_v35, 0.0  ;;  %v179_v44 = vsub.f32 0.0, %v163_v19  ;;  %v164_v49 = vadd.f32 %v148_v46, %v132_v45  ;;  %20 = vst.msk [vmem:[#allocation2] sm:$0xff] %vm19_vm2, %v415_v47 }
  0x97   :  { %262 = vadd.xlane.f32.xlu0 %v261_v27  ;;  %256 = vadd.xlane.f32.xlu1 %v255_v28  ;;  %379 = vpow2.f32 %v201_v40  ;;  %v170_v1 = vadd.f32 %v154_v63, %v138_v62  ;;  %v286_v15 = vlaneseq }
  0x98   :  { %235 = vadd.xlane.f32.xlu2 %v234_v59  ;;  %v203_v48 = vmul.f32 1.442695, %v179_v44  ;;  %v180_v51 = vsub.f32 0.0, %v164_v49 }
  0x99   :  { %v186_v3 = vsub.f32 0.0, %v170_v1  ;;  %v287_v16 = vand.u32 127, %v286_v15 }
  0x9a   :  { %381 = vpow2.f32 %v203_v48  ;;  %v205_v57 = vmul.f32 1.442695, %v180_v51 }
  0x9b   :  { %v376_v39 = vpop.eup %375  ;;  %v217_v7 = vmul.f32 1.442695, %v186_v3  ;;  %v289_v4 = vadd.s32 4294967288, %v287_v16 }
  0x9c   :  { %v258_v23 = vsel %vm220_vm0, %v376_v39, 0.0  ;;  %v378_v43 = vpop.eup %377  ;;  %383 = vpow2.f32 %v205_v57 }
  0x9d   :  { %v240_v20 = vsel %vm220_vm0, %v378_v43, 0.0  ;;  %v380_v50 = vpop.eup %379  ;;  %385 = vpow2.f32 %v217_v7  ;;  %v219_v51 = vld [vmem:[#allocation2] sm:$0xff] }
  0x9e   :  { %v243_v56 = vsel %vm224_vm1, %v380_v50, 0.0 }
  0x9f   :  { %265 = vadd.xlane.f32.xlu1 %v264_v36 }
  0xa0   :  { %238 = vadd.xlane.f32.xlu2 %v237_v38  ;;  %v382_v61 = vpop.eup %381 }
  0xa1   :  { %v246_v0 = vsel %vm220_vm0, %v382_v61, 0.0 }
  0xa2   :  { %v384_v2 = vpop.eup %383 }
  0xa3   :  { %v249_v6 = vsel %vm224_vm1, %v384_v2, 0.0  ;;  %v386_v26 = vpop.eup %385 }
  0xa4   :  { %v267_v55 = vsel %vm224_vm1, %v386_v26, 0.0 }
  0xa8   :  { %241 = vadd.xlane.f32.xlu2 %v240_v20 }
  0xb0   :  { %244 = vadd.xlane.f32.xlu2 %v243_v56 }
  0xb8   :  { %247 = vadd.xlane.f32.xlu2 %v246_v0 }
  0xc0   :  { %250 = vadd.xlane.f32.xlu2 %v249_v6 }
  0xc8   :  { %259 = vadd.xlane.f32.xlu2 %v258_v23 }
  0xd0   :  { %268 = vadd.xlane.f32.xlu2 %v267_v55 }
  0xfa   :  { %v230_v12 = vpop.xlane.xlu0 %229 }
  0xfb   :  { %v223_v42 = vpop.xlane.xlu2 %222  ;;  %v293_v53 = vperm.slane %v230_v12, %v287_v16 }
  0xfc   :  { %v288_v28 = vperm.slane %v223_v42, %v287_v16 }
 0x102   :  { %v233_v14 = vpop.xlane.xlu1 %232  ;;  %v254_v24 = vpop.xlane.xlu0 %253 }
 0x103   :  { %v227_v54 = vpop.xlane.xlu2 %226  ;;  %v294_v25 = vperm.slane %v233_v14, %v289_v4  ;;  %v305_v43 = vperm.slane %v254_v24, %v287_v16 }
 0x104   :  { %v290_v52 = vperm.slane %v227_v54, %v289_v4 }
 0x105   :  { %v295_v32 = vsel %vm291_vm3, %v294_v25, %v293_v53 }
 0x106   :  { %v292_v33 = vsel %vm291_vm3, %v290_v52, %v288_v28 }
 0x107   :  { %v315_v18 = vsel %vm314_vm4, %v295_v32, %v292_v33 }
 0x10a   :  { %v257_v5 = vpop.xlane.xlu1 %256  ;;  %v263_v36 = vpop.xlane.xlu0 %262 }
 0x10b   :  { %v236_v8 = vpop.xlane.xlu2 %235  ;;  %v306_v23 = vperm.slane %v257_v5, %v289_v4  ;;  %v309_v19 = vperm.slane %v263_v36, %v289_v4 }
 0x10c   :  { %v296_v29 = vperm.slane %v236_v8, %v287_v16 }
 0x10d   :  { %v307_v20 = vsel %vm291_vm3, %v306_v23, %v305_v43 }
 0x112   :  { %v266_v22 = vpop.xlane.xlu1 %265 }
 0x113   :  { %v239_v9 = vpop.xlane.xlu2 %238  ;;  %v311_v48 = vperm.slane %v266_v22, %v287_v16 }
 0x114   :  { %v297_v27 = vperm.slane %v239_v9, %v289_v4 }
 0x116   :  { %v298_v35 = vsel %vm291_vm3, %v297_v27, %v296_v29 }
 0x117   :  { %v317_v40 = vsel %vm316_vm5, %v298_v35, %v315_v18 }
 0x11b   :  { %v242_v10 = vpop.xlane.xlu2 %241 }
 0x11c   :  { %v299_v34 = vperm.slane %v242_v10, %v287_v16 }
 0x123   :  { %v245_v11 = vpop.xlane.xlu2 %244 }
 0x124   :  { %v300_v59 = vperm.slane %v245_v11, %v289_v4 }
 0x126   :  { %v301_v37 = vsel %vm291_vm3, %v300_v59, %v299_v34 }
 0x127   :  { %v319_v41 = vsel %vm318_vm6, %v301_v37, %v317_v40 }
 0x12b   :  { %v248_v13 = vpop.xlane.xlu2 %247 }
 0x12c   :  { %v302_v17 = vperm.slane %v248_v13, %v287_v16 }
 0x133   :  { %v251_v21 = vpop.xlane.xlu2 %250 }
 0x134   :  { %v303_v30 = vperm.slane %v251_v21, %v289_v4 }
 0x136   :  { %v304_v38 = vsel %vm291_vm3, %v303_v30, %v302_v17 }
 0x137   :  { %v321_v44 = vsel %vm320_vm7, %v304_v38, %v319_v41 }
 0x138   :  { %v323_v50 = vsel %vm322_vm8, %v307_v20, %v321_v44 }
 0x13b   :  { %v260_v31 = vpop.xlane.xlu2 %259 }
 0x13c   :  { %v308_v39 = vperm.slane %v260_v31, %v287_v16 }
 0x13e   :  { %v310_v45 = vsel %vm291_vm3, %v309_v19, %v308_v39 }
 0x13f   :  { %v325_v56 = vsel %vm324_vm9, %v310_v45, %v323_v50 }
 0x143   :  { %v269_v46 = vpop.xlane.xlu2 %268 }
 0x144   :  { %v312_v49 = vperm.slane %v269_v46, %v289_v4 }
 0x146   :  { %v313_v57 = vsel %vm291_vm3, %v312_v49, %v311_v48 }
 0x147   :  { %v327_v58 = vsel %vm326_vm10, %v313_v57, %v325_v56 }
 0x148   :  { %v329_v60 = vadd.f32 %v327_v58, %v219_v51 }
 0x14a   :  { %331 = vst.msk [vmem:[#allocation2] sm:$0xff] %vm19_vm2, %v329_v60 }
 0x14b   :  { %342 = dma.vmem_to_hbm [thread:$0]  %s338_s1, 128, %s340_s21, [#allocation3]  }
 0x14c   :  { %411 = dma.done.wait [#allocation3], 128  }
 0x14d   :  { %412 = vsyncadd [#allocation3], 4294967168 }
 0x14e   :  { %347 = vsyncpa [#allocation3], 1 }

</bundles_post_ra>
